<compile_context>
chip_gen: v7x
topology: tpu7x:2x2x1
jax: 0.10.0
libtpu: 0.0.40
codegen_flags: <defaults>
</compile_context>

<pallas_src>
import functools

import jax
import jax.numpy as jnp
from jax.experimental import pallas as pl
from jax.experimental.pallas import tpu as pltpu


_BLOCK_BUDGET_BYTES = 2 * 1024 * 1024  # per input block (before double-buffering)


def _sumpool_kernel(x_ref, o_ref, *, kk, inv):
    """x_ref: (1, k^3, Dt, Ft)  ->  o_ref: (1, Dt, Ft).

    The k^3 window offsets are a leading axis, so the whole 3-D average pool is
    just an elementwise sum of kk slabs followed by a scale.  No relayouts."""
    acc = x_ref[0, 0]
    for i in range(1, kk):
        acc = acc + x_ref[0, i]
    o_ref[0] = (acc * inv).astype(o_ref.dtype)


def _choose_tiles(Do, F, KK, elem_bytes=4, budget=_BLOCK_BUDGET_BYTES):
    """Pick (Dt, Ft) tile sizes: as large as possible within the VMEM budget,
    respecting (8, 128) alignment (or full-extent) on the block's last two dims."""
    # Lane tile: keep the full lane extent unless even a single depth row blows
    # the budget AND the lane extent can be split on a 128 boundary.
    Ft = F
    if KK * F * elem_bytes > budget and F % 128 == 0:
        cap = max(128, (budget // (KK * elem_bytes)) // 128 * 128)
        ft = cap
        while ft >= 128 and F % ft != 0:
            ft -= 128
        if ft >= 128:
            Ft = ft
    # Depth tile: largest divisor of Do (full extent, or a multiple of 8) that fits.
    cands = [d for d in range(1, Do + 1) if Do % d == 0 and (d == Do or d % 8 == 0)]
    fitting = [d for d in cands if KK * d * Ft * elem_bytes <= budget]
    Dt = max(fitting) if fitting else min(cands)
    return Dt, Ft


def _avgpool3d_pallas(xk, k):
    """xk: float32 [B, k^3, Do, F]  (F = Ho*Wo*C2)  ->  float32 [B, Do, F]."""
    B, KK, Do, F = xk.shape
    assert KK == k ** 3
    Dt, Ft = _choose_tiles(Do, F, KK)
    grid = (B, Do // Dt, F // Ft)

    kern = functools.partial(_sumpool_kernel, kk=KK, inv=1.0 / float(KK))
    return pl.pallas_call(
        kern,
        grid=grid,
        in_specs=[pl.BlockSpec((1, KK, Dt, Ft), lambda b, d, f: (b, 0, d, f))],
        out_specs=pl.BlockSpec((1, Dt, Ft), lambda b, d, f: (b, d, f)),
        out_shape=jax.ShapeDtypeStruct((B, Do, F), jnp.float32),
        compiler_params=pltpu.CompilerParams(
            dimension_semantics=("parallel", "parallel", "parallel"),
            vmem_limit_bytes=32 * 1024 * 1024,
        ),
    )(xk)


def se3_avg_pool(parts, kernel_size):
    """Pallas equivalent of SE3AvgPool.forward.

    parts: list of complex arrays [B, X, Y, Z, 2l+1, c_l]
    returns: list of complex64 arrays [B, X//k, Y//k, Z//k, 2l+1, c_l]
    """
    k = int(kernel_size)
    B, X, Y, Z = parts[0].shape[:4]

    # merge_channel_dim (channel_last=True)
    merged, chans = [], []
    for p in parts:
        m, c = p.shape[4], p.shape[5]
        chans.append((m, c))
        merged.append(p.reshape(B, X, Y, Z, m * c))
    x = jnp.concatenate(merged, axis=-1)                  # complex [B,X,Y,Z,Cm]
    Cm = x.shape[-1]

    # complex -> interleaved float32 channels (re, im per channel).  Exact,
    # since average pooling never mixes channel positions.
    # TODO(synk): complex128 inputs are downcast to complex64 here.
    xr = jnp.real(x).astype(jnp.float32)
    xi = jnp.imag(x).astype(jnp.float32)
    C2 = 2 * Cm
    xf = jnp.stack([xr, xi], axis=-1).reshape(B, X, Y, Z, C2)

    # Floor semantics of nn.AvgPool3d (padding=0): drop trailing rows that do
    # not form a full window.
    Do, Ho, Wo = X // k, Y // k, Z // k
    assert Do >= 1 and Ho >= 1 and Wo >= 1, "spatial extent smaller than kernel"
    xf = xf[:, :Do * k, :Ho * k, :Wo * k, :]

    # Rearrange (one fused XLA pass) so the k^3 window offsets form one leading
    # axis and (ho, wo, channel) are flattened onto the lane axis:
    #   [B, k^3, Do, Ho*Wo*C2]
    xk = xf.reshape(B, Do, k, Ho, k, Wo, k, C2)
    xk = xk.transpose(0, 2, 4, 6, 1, 3, 5, 7)             # [B,k,k,k,Do,Ho,Wo,C2]
    xk = xk.reshape(B, k ** 3, Do, Ho * Wo * C2)

    yf = _avgpool3d_pallas(xk, k)                         # [B, Do, Ho*Wo*C2] f32

    y = yf.reshape(B, Do, Ho, Wo, Cm, 2)
    y = jax.lax.complex(y[..., 0], y[..., 1])             # complex64 [B,Do,Ho,Wo,Cm]

    # split_channel_dim (channel_last=True)
    out, off = [], 0
    for (m, c) in chans:
        out.append(y[..., off:off + m * c].reshape(B, Do, Ho, Wo, m, c))
        off += m * c
    return out


def _ref_avgpool3d_complex(x, k):
    """Pure-JAX reference: average pool over the 3 spatial dims of [B,D,H,W,C]."""
    B, D, H, W, C = x.shape
    x = x.reshape(B, D // k, k, H // k, k, W // k, k, C)
    return x.mean(axis=(2, 4, 6))


if __name__ == "__main__":
    key = jax.random.PRNGKey(0)
    B, S = 2, 8                 # batch, spatial extent (X=Y=Z=8)
    kernel_size = 2
    # parts: l=0 with 4 channels, l=1 with 2 channels
    part_shapes = [(B, S, S, S, 1, 4), (B, S, S, S, 3, 2)]

    parts = []
    for shp in part_shapes:
        key, kr, ki = jax.random.split(key, 3)
        re = jax.random.normal(kr, shp, dtype=jnp.float32)
        im = jax.random.normal(ki, shp, dtype=jnp.float32)
        parts.append(jax.lax.complex(re, im))

    pooled = se3_avg_pool(parts, kernel_size)
    pooled = jax.block_until_ready(pooled)

    # lightweight correctness check against a pure-JAX reference
    So = S // kernel_size
    merged_in = jnp.concatenate(
        [p.reshape(B, S, S, S, -1) for p in parts], axis=-1
    )
    ref_merged = _ref_avgpool3d_complex(merged_in, kernel_size)
    got_merged = jnp.concatenate(
        [p.reshape(B, So, So, So, -1) for p in pooled], axis=-1
    )
    assert got_merged.shape == ref_merged.shape
    assert jnp.allclose(got_merged, ref_merged, atol=1e-5, rtol=1e-5)
    assert pooled[0].shape == (B, So, So, So, 1, 4)
    assert pooled[1].shape == (B, So, So, So, 3, 2)
    assert pooled[0].dtype == jnp.complex64

    print("KERNEL_OK")
</pallas_src>

<mosaic_0001>
module attributes {stable_mosaic.version = 11 : i64} {
  func.func @_sumpool_kernel(%arg0: i32, %arg1: i32, %arg2: i32, %arg3: memref<1x8x4x320xf32, #tpu.memory_space<vmem>>, %arg4: memref<1x4x320xf32, #tpu.memory_space<vmem>>) attributes {dimension_semantics = [#tpu.dimension_semantics<parallel>, #tpu.dimension_semantics<parallel>, #tpu.dimension_semantics<parallel>], iteration_bounds = array<i64: 2, 1, 1>, scalar_prefetch = 0 : i64, scratch_operands = 0 : i64, tpu.core_type = #tpu.core_type<tc>, window_params = [{transform_indices = @transform_0, window_bounds = array<i64: 1, 8, 4, 320>}, {transform_indices = @transform_1, window_bounds = array<i64: 1, 4, 320>}]} {
    %c0 = arith.constant 0 : index
    %c0_0 = arith.constant 0 : index
    %c0_1 = arith.constant 0 : index
    %c0_2 = arith.constant 0 : index
    %0 = vector.load %arg3[%c0, %c0_0, %c0_1, %c0_2] : memref<1x8x4x320xf32, #tpu.memory_space<vmem>>, vector<1x1x4x320xf32>
    %1 = vector.shape_cast %0 : vector<1x1x4x320xf32> to vector<4x320xf32>
    %c0_3 = arith.constant 0 : index
    %c1 = arith.constant 1 : index
    %c0_4 = arith.constant 0 : index
    %c0_5 = arith.constant 0 : index
    %2 = vector.load %arg3[%c0_3, %c1, %c0_4, %c0_5] : memref<1x8x4x320xf32, #tpu.memory_space<vmem>>, vector<1x1x4x320xf32>
    %3 = vector.shape_cast %2 : vector<1x1x4x320xf32> to vector<4x320xf32>
    %4 = arith.addf %1, %3 : vector<4x320xf32>
    %c0_6 = arith.constant 0 : index
    %c2 = arith.constant 2 : index
    %c0_7 = arith.constant 0 : index
    %c0_8 = arith.constant 0 : index
    %5 = vector.load %arg3[%c0_6, %c2, %c0_7, %c0_8] : memref<1x8x4x320xf32, #tpu.memory_space<vmem>>, vector<1x1x4x320xf32>
    %6 = vector.shape_cast %5 : vector<1x1x4x320xf32> to vector<4x320xf32>
    %7 = arith.addf %4, %6 : vector<4x320xf32>
    %c0_9 = arith.constant 0 : index
    %c3 = arith.constant 3 : index
    %c0_10 = arith.constant 0 : index
    %c0_11 = arith.constant 0 : index
    %8 = vector.load %arg3[%c0_9, %c3, %c0_10, %c0_11] : memref<1x8x4x320xf32, #tpu.memory_space<vmem>>, vector<1x1x4x320xf32>
    %9 = vector.shape_cast %8 : vector<1x1x4x320xf32> to vector<4x320xf32>
    %10 = arith.addf %7, %9 : vector<4x320xf32>
    %c0_12 = arith.constant 0 : index
    %c4 = arith.constant 4 : index
    %c0_13 = arith.constant 0 : index
    %c0_14 = arith.constant 0 : index
    %11 = vector.load %arg3[%c0_12, %c4, %c0_13, %c0_14] : memref<1x8x4x320xf32, #tpu.memory_space<vmem>>, vector<1x1x4x320xf32>
    %12 = vector.shape_cast %11 : vector<1x1x4x320xf32> to vector<4x320xf32>
    %13 = arith.addf %10, %12 : vector<4x320xf32>
    %c0_15 = arith.constant 0 : index
    %c5 = arith.constant 5 : index
    %c0_16 = arith.constant 0 : index
    %c0_17 = arith.constant 0 : index
    %14 = vector.load %arg3[%c0_15, %c5, %c0_16, %c0_17] : memref<1x8x4x320xf32, #tpu.memory_space<vmem>>, vector<1x1x4x320xf32>
    %15 = vector.shape_cast %14 : vector<1x1x4x320xf32> to vector<4x320xf32>
    %16 = arith.addf %13, %15 : vector<4x320xf32>
    %c0_18 = arith.constant 0 : index
    %c6 = arith.constant 6 : index
    %c0_19 = arith.constant 0 : index
    %c0_20 = arith.constant 0 : index
    %17 = vector.load %arg3[%c0_18, %c6, %c0_19, %c0_20] : memref<1x8x4x320xf32, #tpu.memory_space<vmem>>, vector<1x1x4x320xf32>
    %18 = vector.shape_cast %17 : vector<1x1x4x320xf32> to vector<4x320xf32>
    %19 = arith.addf %16, %18 : vector<4x320xf32>
    %c0_21 = arith.constant 0 : index
    %c7 = arith.constant 7 : index
    %c0_22 = arith.constant 0 : index
    %c0_23 = arith.constant 0 : index
    %20 = vector.load %arg3[%c0_21, %c7, %c0_22, %c0_23] : memref<1x8x4x320xf32, #tpu.memory_space<vmem>>, vector<1x1x4x320xf32>
    %21 = vector.shape_cast %20 : vector<1x1x4x320xf32> to vector<4x320xf32>
    %22 = arith.addf %19, %21 : vector<4x320xf32>
    %cst = arith.constant 1.250000e-01 : f32
    %23 = vector.broadcast %cst : f32 to vector<4x320xf32>
    %24 = arith.mulf %22, %23 : vector<4x320xf32>
    %c0_24 = arith.constant 0 : index
    %c0_25 = arith.constant 0 : index
    %c0_26 = arith.constant 0 : index
    %25 = vector.load %arg4[%c0_24, %c0_25, %c0_26] : memref<1x4x320xf32, #tpu.memory_space<vmem>>, vector<1x4x320xf32>
    %26 = vector.shape_cast %25 : vector<1x4x320xf32> to vector<4x320xf32>
    %27 = vector.shape_cast %24 : vector<4x320xf32> to vector<1x4x320xf32>
    tpu.vector_store %arg4[%c0_24, %c0_25, %c0_26], %27 {strides = array<i32>} : memref<1x4x320xf32, #tpu.memory_space<vmem>>, vector<1x4x320xf32>,
    return
  }
  func.func @transform_0(%arg0: i32, %arg1: i32, %arg2: i32) -> (i32, i32, i32, i32) {
    %c0_i32 = arith.constant 0 : i32
    %c0_i32_0 = arith.constant 0 : i32
    return %arg0, %c0_i32, %arg1, %arg2 : i32, i32, i32, i32
  }
  func.func @transform_1(%arg0: i32, %arg1: i32, %arg2: i32) -> (i32, i32, i32) {
    %c0_i32 = arith.constant 0 : i32
    return %arg0, %arg1, %arg2 : i32, i32, i32
  }
}

</mosaic_0001>

<bundles_post_ra>
// kernel: tpu_custom_call.1
= control target key start
LH: loop header
LB: loop body
LE: loop exit
PB: predicated region body
PF: predicated region fallthrough
CT: control target
= control target key end

     0   :  { %6 = vsyncpa [#allocation3], 0  ;;  %s732_s0 = inlined_call_operand.hbm [shape: f32[2,8,4,320], index: 0, kind: input, shape index: {}]   ;;  %s733_s1 = inlined_call_operand.hbm [shape: f32[2,4,320], index: 1, kind: output, shape index: {}]  }
   0x1   :  { %8 = vsyncpa [#allocation3 + $0x1], 0 }
   0x2   :  { %9 = vsyncpa [#allocation4], 0 }
   0x3   :  { %11 = vsyncpa [#allocation4 + $0x1], 0  ;;  %s540_s6 = smov 0   ;;  %s542_s7 = smov 0  }
   0x4   :  { %s544_s8 = smov 0   ;;  %s546_s9 = smov 0  }
   0x5   :  { %s548_s10 = smov 0   ;;  %s550_s11 = smov 0  }
   0x6 LB: > { %s320_s12 = sadd.s32 4294967295, %s524_s11   ;;  %s321_s13 = sadd.s32 4294967294, %s524_s11   ;;  %s524_s11 = sphi %s550_s11, %s17_s11   ;;  %s520_s10 = sphi %s548_s10, %s748_s10   ;;  %s516_s9 = sphi %s546_s9, %s747_s9   ;;  %s512_s8 = sphi %s544_s8, %s746_s8   ;;  %s508_s7 = sphi %s542_s7, %s745_s7   ;;  %s504_s6 = sphi %s540_s6, %s744_s6  }
   0x7   : > { %s36_s14 = sadd.s32 1, %s520_s10  ;;  %s47_s15 = sadd.s32 1, %s512_s8 }
   0x8   : > { %p38_p0 = scmp.ge.s32.totalorder %s36_s14, 2  ;;  %p54_p1 = scmp.ne.s32.totalorder %s512_s8, %s508_s7 }
   0x9   : > { %p55_p2 = scmp.eq.s32.totalorder %s524_s11, 0  ;;  %p60_p3 = scmp.ne.s32.totalorder %s508_s7, %s504_s6 }
   0xa   : > { %s750_s14 = smov (%p38_p0, %s36_s14), 0  ;;  %p61_p5 = scmp.eq.s32.totalorder %s320_s12, 0 }
   0xb   : > { %p581_p4 = por %p55_p2, %p54_p1  ;;  %s40_s17 = ssub.s32 %s520_s10, %s750_s14 }
   0xc   : > { %p88_p6 = scmp.eq.s32.totalorder %s320_s12, 1  ;;  %p45_p7 = scmp.eq.s32.totalorder %s40_s17, 0 }
   0xd   : > { %p587_p8 = por %p61_p5, %p60_p3  ;;  %p94_p10 = scmp.eq.s32.totalorder %s321_s13, 1 }
   0xe   : > { %p591_p9 = por %p88_p6, %p54_p1  ;;  %p360_p13 = scmp.lt.s32.totalorder %s524_s11, 2 }
   0xf   : > { %s596_s20 = scalar_select %p45_p7, %s512_s8, %s47_s15  }
  0x10   : > { %s737_s19 = scalar_select %p591_p9, 1, 0 }
  0x11   : > { %p598_p11 = por %p94_p10, %p60_p3  ;;  %s114_s22 = sand.u32 1, %s512_s8  }
  0x12   : > { %s343_s23 = smul.u32 96, %s114_s22  ;;  %p608_p0 = pnand %p360_p13, %p581_p4 }
  0x13   : > { %s738_s21 = scalar_select %p598_p11, 1, 0 }
  0x14   : > { %s344_s24 = smul.u32 1536, %s520_s10  ;;  %s118_s29 = scalar_lea.vmem [#allocation2], %s343_s23 }
  0x15   : > { %s129_s30 = sshll.u32 %s118_s29, 4  ;;  %s620_s2 = scalar_lea.sflag [#allocation3], %s114_s22  ;;  %s617_s30 = int_to_ptr.vmem [resolvable:$true] %s129_s30 }
  0x16   : > { %s615_s28 = scalar_lea.hbm %s732_s0, %s344_s24  ;;  %p414_p3 = pneg %p608_p0 }
  0x17   : > { %s412_s3 = scalar_lea.hbm %s615_s28, 1536  ;;  %s417_s12 = scalar_lea.hbm %s732_s0, 3072 }
  0x18   : > { %p413_p2 = scmp.ne.s32.totalorder %s615_s28, %s412_s3  ;;  %p418_p6 = scmp.lt.u32.totalorder %s615_s28, %s732_s0 }
  0x19   : > { %p419_p7 = scmp.lt.u32.totalorder %s417_s12, %s412_s3  ;;  %p421_p13 = scmp.lt.u32.totalorder %s412_s3, %s615_s28 }
  0x1a   : > { %p415_p4 = pnand %p414_p3, %p413_p2 }
  0x1b   : > { %p420_p10 = por %p419_p7, %p418_p6 }
  0x1c   : > { %p416_p5 = pneg %p415_p4 }
  0x1d   : > { %p422_p12 = por %p421_p13, %p420_p10 }
  0x1f   : > { %p423_p1 = pnand %p422_p12, %p416_p5 }
  0x21   : > { %426 = shalt.err (!%p423_p1)
}
  0x22   : > { %s427_s16 = scalar_lea.vmem %s617_s30, 1536  ;;  %s526_s17 = smov [#allocation2]  }
  0x23   : > { %p428_p2 = scmp.ne.s32.totalorder %s617_s30, %s427_s16  ;;  %s432_s22 = sshll.u32 %s526_s17, 4  ;;  %s433_s22 = int_to_ptr.vmem [resolvable:$false] %s432_s22 }
  0x24   : > { %s434_s23 = scalar_lea.vmem %s433_s22, 3072  ;;  %p435_p9 = scmp.lt.s32.totalorder %s617_s30, %s433_s22 }
  0x25   : > { %p430_p4 = pnand %p428_p2, %p414_p3  ;;  %p436_p6 = scmp.lt.s32.totalorder %s434_s23, %s427_s16 }
  0x27   : > { %p431_p11 = pneg %p430_p4  ;;  %p437_p7 = por %p436_p6, %p435_p9 }
  0x29   : > { %p438_p10 = pnand %p437_p7, %p431_p11 }
  0x2b   : > { %441 = shalt.err (!%p438_p10)
}
  0x2c   : > { %s527_s24 = smov 192   ;;  %s528_s26 = smov 12  }
  0x2d   : > { %355 = dma.hbm_to_vmem [thread:$0]  (!%p608_p0), %s615_s28, 1536, %s617_s30, %s620_s2, %s527_s24, %s527_s24, %s528_s26  }
  0x2e   : > { %p137_p12 = scmp.lt.s32.totalorder %s524_s11, 3  ;;  %p740_p1 = scmp.ge.s32.totalorder %s524_s11, 1 }
  0x30   : > { %p138_p3 = pnand %p740_p1, %p137_p12 }
  0x31   : > { %s652_s27 = sand.u32 (!%p138_p3), 1, %s508_s7  }
  0x32   : > { %141 = sbr.rel (%p138_p3) target bundleno = 91 (0x5b), region = 24  ;;  %s144_s3 = scalar_lea.sflag (!%p138_p3), [#allocation3], %s652_s27 }
  0x33   : > { %s345_s29 = smul.u32 (!%p138_p3), 96, %s652_s27 }
  0x35   : > { %s656_s4 = scalar_lea.vmem (!%p138_p3), [#allocation2], %s345_s29 }
  0x39   : > { %495 = dma.done.wait (%p587_p8), %s144_s3, 1536  }
  0x3a   : > { %497 = vsyncadd (%p587_p8), %s144_s3, 4294965760  ;;  %v168_v0 = vld [vmem:[%s656_s4] sm:$0xff]  ;;  %v326_v1 = vld [vmem:[%s656_s4 + $0xc] sm:$0xff]  ;;  %s346_s18 = smul.u32 12, %s652_s27  ;;  %vm208_vm0 = vcmask 519168   ;;  %s211_s13 = scalar_lea.sflag [#allocation4], %s652_s27 }
  0x3b   : > { %v328_v2 = vld [vmem:[%s656_s4 + $0x18] sm:$0xff]  ;;  %v173_v3 = vadd.f32 %v326_v1, %v168_v0  ;;  %v330_v4 = vld [vmem:[%s656_s4 + $0x24] sm:$0xff]  ;;  %v327_v7 = vld [vmem:[%s656_s4 + $0x14] sm:$0xf]  ;;  %s347_s25 = smul.u32 192, %s516_s9  ;;  %p741_p9 = scmp.ne.s32.totalorder %s737_s19, 0 }
  0x3c   : > { %v169_v5 = vld [vmem:[%s656_s4 + $0x8] sm:$0xf]  ;;  %v329_v8 = vld [vmem:[%s656_s4 + $0x20] sm:$0xf]  ;;  %v332_v9 = vld [vmem:[%s656_s4 + $0x30] sm:$0xff]  ;;  %s165_s28 = scalar_lea.vmem [#allocation5], %s346_s18 }
  0x3d   : > { %v178_v6 = vadd.f32 %v328_v2, %v173_v3  ;;  %v174_v10 = vadd.f32 %v327_v7, %v169_v5  ;;  %v331_v12 = vld [vmem:[%s656_s4 + $0x2c] sm:$0xf]  ;;  %v334_v13 = vld [vmem:[%s656_s4 + $0x3c] sm:$0xff]  ;;  %v333_v16 = vld [vmem:[%s656_s4 + $0x38] sm:$0xf]  ;;  %s229_s30 = sshll.u32 %s165_s28, 4  ;;  %s685_s12 = scalar_lea.hbm %s733_s1, %s347_s25  ;;  %s680_s30 = int_to_ptr.vmem [resolvable:$true] %s229_s30 }
  0x3e   : > { %v336_v17 = vld [vmem:[%s656_s4 + $0x48] sm:$0xff]  ;;  %v335_v20 = vld [vmem:[%s656_s4 + $0x44] sm:$0xf]  ;;  %v338_v21 = vld [vmem:[%s656_s4 + $0x54] sm:$0xff]  ;;  %s442_s9 = scalar_lea.vmem %s680_s30, 192  ;;  %s529_s15 = smov [#allocation5]  }
  0x3f   : > { %v183_v11 = vadd.f32 %v330_v4, %v178_v6  ;;  %v179_v14 = vadd.f32 %v329_v8, %v174_v10  ;;  %v337_v24 = vld [vmem:[%s656_s4 + $0x50] sm:$0xf]  ;;  %v339_v27 = vld [vmem:[%s656_s4 + $0x5c] sm:$0xf]  ;;  %p443_p8 = scmp.ne.s32.totalorder %s680_s30, %s442_s9  ;;  %s446_s16 = sshll.u32 %s529_s15, 4  ;;  %s447_s16 = int_to_ptr.vmem [resolvable:$false] %s446_s16 }
  0x40   : > { %s448_s17 = scalar_lea.vmem %s447_s16, 384  ;;  %p449_p5 = scmp.lt.s32.totalorder %s680_s30, %s447_s16 }
  0x41   : > { %v188_v15 = vadd.f32 %v332_v9, %v183_v11  ;;  %v184_v18 = vadd.f32 %v331_v12, %v179_v14  ;;  %p444_p11 = pnand %p443_p8, %p741_p9  ;;  %p450_p13 = scmp.lt.s32.totalorder %s448_s17, %s442_s9 }
  0x43   : > { %v193_v19 = vadd.f32 %v334_v13, %v188_v15  ;;  %v189_v22 = vadd.f32 %v333_v16, %v184_v18  ;;  %p445_p0 = pneg %p444_p11  ;;  %p451_p2 = por %p450_p13, %p449_p5 }
  0x45   : > { %v198_v23 = vadd.f32 %v336_v17, %v193_v19  ;;  %v194_v25 = vadd.f32 %v335_v20, %v189_v22  ;;  %p452_p4 = pnand %p451_p2, %p445_p0 }
  0x47   : > { %v203_v26 = vadd.f32 %v338_v21, %v198_v23  ;;  %v199_v28 = vadd.f32 %v337_v24, %v194_v25 }
  0x49   : > { %v205_v29 = vmul.f32 0.125, %v203_v26  ;;  %v204_v30 = vadd.f32 %v339_v27, %v199_v28 }
  0x4b   : > { %207 = vst [vmem:[%s165_s28] sm:$0xff] %v205_v29  ;;  %v206_v31 = vmul.f32 0.125, %v204_v30 }
  0x4d   : > { %209 = vst.msk [vmem:[%s165_s28 + $0x8] sm:$0xf] %vm208_vm0, %v206_v31 }
  0x4e   : > { %455 = shalt.err (!%p452_p4)
}
  0x4f   : > { %s456_s22 = scalar_lea.hbm %s685_s12, 192  ;;  %s460_s26 = scalar_lea.hbm %s733_s1, 384 }
  0x50   : > { %p457_p6 = scmp.ne.s32.totalorder %s685_s12, %s456_s22  ;;  %p461_p12 = scmp.lt.u32.totalorder %s685_s12, %s733_s1 }
  0x51   : > { %p462_p1 = scmp.lt.u32.totalorder %s460_s26, %s456_s22  ;;  %p464_p8 = scmp.lt.u32.totalorder %s456_s22, %s685_s12 }
  0x52   : > { %p458_p7 = pnand %p457_p6, %p741_p9 }
  0x53   : > { %p463_p3 = por %p462_p1, %p461_p12 }
  0x54   : > { %p459_p10 = pneg %p458_p7 }
  0x55   : > { %p465_p11 = por %p464_p8, %p463_p3 }
  0x57   : > { %p466_p0 = pnand %p465_p11, %p459_p10 }
  0x59   : > { %469 = shalt.err (!%p466_p0)
}
  0x5a   : > { %350 = dma.vmem_to_hbm [thread:$0]  (%p741_p9), %s680_s30, 192, %s685_s12, %s211_s13  }
  0x5b PF: > { %s241_s3 = sand.u32 1, %s504_s6   ;;  %p742_p5 = scmp.ne.s32.totalorder %s738_s21, 0 }
  0x5c   : > { %p743_p13 = scmp.ge.s32.totalorder %s524_s11, 2  ;;  %s242_s4 = scalar_lea.sflag [#allocation4], %s241_s3 }
  0x5e   : > { %p357_p2 = pnand %p743_p13, %p742_p5 }
  0x60   : > { %499 = dma.done.wait (!%p357_p2), %s242_s4, 192  }
  0x61   : > { %501 = vsyncadd (!%p357_p2), %s242_s4, 4294967104  ;;  %s17_s11 = sadd.s32 1, %s524_s11   ;;  %s744_s6 = smov %s508_s7 }
  0x62   : > { %p14_p4 = scmp.ge.s32.totalorder %s17_s11, 4   ;;  %s745_s7 = smov %s512_s8 }
  0x63   : > { %s746_s8 = smov %s596_s20  ;;  %s747_s9 = smov %s520_s10 }
  0x64   : > { %s748_s10 = smov %s750_s14  ;;  %16 = sbr.rel (!%p14_p4) target bundleno = 6 (0x6), region = 76 }
  0x6b   :  { %247 = vsyncpa [#allocation3], 1 }
  0x6c   :  { %249 = vsyncpa [#allocation3 + $0x1], 1 }
  0x6d   :  { %250 = vsyncpa [#allocation4], 1 }
  0x6e   :  { %252 = vsyncpa [#allocation4 + $0x1], 1 }

</bundles_post_ra>
